<compile_context>
chip_gen: v7x
topology: tpu7x:2x2x1
jax: 0.10.0
libtpu: 0.0.40
codegen_flags: <defaults>
</compile_context>

<pallas_src>
import functools

import jax
import jax.numpy as jnp
from jax.experimental import pallas as pl
from jax.experimental.pallas import tpu as pltpu

_LANE = 128       # lane width (output last dim padded to this -> unmasked vst)
_SUBLANE = 8      # f32 sublane count (row tiles kept a multiple of this)
_NEG_INF = -1e30  # bias padding value so padded logits disappear in softmax


def _round_up(x, m):
    return ((x + m - 1) // m) * m


def ace_head_kernel(x_ref, w_ref, b_ref, o_ref):
    """Fused Linear + numerically-stable Softmax(last dim).

    x_ref: (TILE_M, E)      tile of the flattened (B*T, E) features
    w_ref: (E, C_pad)       full weight (transposed, lane-padded with zeros)
    b_ref: (1, C_pad)       bias (padded lanes = -1e30 -> masked out of softmax)
    o_ref: (TILE_M, C_pad)  softmax probabilities (padded lanes ~ 0)
    """
    logits = jnp.dot(x_ref[...], w_ref[...],
                     preferred_element_type=jnp.float32) + b_ref[...]
    m = jnp.max(logits, axis=-1, keepdims=True)
    e = jnp.exp(logits - m)
    denom = jnp.sum(e, axis=-1, keepdims=True)
    # approx=True would push the reciprocal to the (idle) EUP, but its ~1e-3
    # relative error breaks a rows-sum-to-1-within-1e-5 contract, so keep the
    # exact reciprocal here.
    o_ref[...] = (e * pl.reciprocal(denom, approx=False)).astype(o_ref.dtype)


def prepare_ace_head_params(weight, bias, *, param_dtype=None):
    """One-time parameter prep, hoisted off the per-call forward path.

    weight: (C, E) in PyTorch nn.Linear layout; bias: (C,).
    Returns (w_t_padded (E, C_pad), bias_padded (1, C_pad), num_class C).
    Padded weight columns are zero; padded bias lanes are -1e30 so the padded
    logits contribute nothing to the softmax max or denominator.
    Pass param_dtype=jnp.bfloat16 on v6e/v7x to halve operand HBM traffic
    (accumulation stays f32 via preferred_element_type in the kernel).
    """
    C, E = weight.shape
    c_pad = _round_up(max(C, _LANE), _LANE)
    w_dtype = param_dtype if param_dtype is not None else weight.dtype
    w_t = jnp.zeros((E, c_pad), w_dtype).at[:, :C].set(weight.T.astype(w_dtype))
    b = jnp.full((1, c_pad), _NEG_INF, dtype=jnp.float32)
    b = b.at[0, :C].set(bias.astype(jnp.float32))
    return w_t, b, C


@functools.partial(jax.jit, static_argnames=("num_class", "max_tile_m"))
def ace_head_forward(encode_feature, w_t_padded, bias_padded, *, num_class,
                     max_tile_m=512):
    """encode_feature: (B, T, E); params from prepare_ace_head_params."""
    B, T, E = encode_feature.shape
    c_pad = w_t_padded.shape[1]
    M = B * T
    m8 = _round_up(M, _SUBLANE)

    # Row tile: as large as allowed (multiple of 8), but keep >= 2 grid steps
    # when the problem permits so v7x's second TensorCore gets work.
    tile_m = min(max_tile_m, m8)
    if (m8 // tile_m) < 2 and m8 >= 2 * _SUBLANE:
        tile_m = _round_up(pl.cdiv(m8, 2), _SUBLANE)
    grid_m = pl.cdiv(M, tile_m)
    m_pad = grid_m * tile_m

    x = encode_feature.reshape(M, E)
    if w_t_padded.dtype != x.dtype:
        x = x.astype(w_t_padded.dtype)  # e.g. bf16 operands on v6e/v7x
    if m_pad != M:
        # Pad rows so the grid covers M exactly; padded rows are discarded below.
        x = jnp.zeros((m_pad, E), x.dtype).at[:M].set(x)

    out = pl.pallas_call(
        ace_head_kernel,
        out_shape=jax.ShapeDtypeStruct((m_pad, c_pad), encode_feature.dtype),
        grid_spec=pltpu.PrefetchScalarGridSpec(
            num_scalar_prefetch=0,
            grid=(grid_m,),
            in_specs=[
                pl.BlockSpec((tile_m, E), lambda i: (i, 0)),   # feature tile
                pl.BlockSpec((E, c_pad), lambda i: (0, 0)),    # full weight
                pl.BlockSpec((1, c_pad), lambda i: (0, 0)),    # bias
            ],
            out_specs=pl.BlockSpec((tile_m, c_pad), lambda i: (i, 0)),
        ),
        compiler_params=pltpu.CompilerParams(
            dimension_semantics=("parallel",),
            # NOTE: if E / num_class grow, budget VMEM against v7x's 64 MiB
            # and set vmem_limit_bytes explicitly; tiny at current sizes.
        ),
    )(x, w_t_padded, bias_padded)

    return out[:M, :num_class].reshape(B, T, num_class)


def _kaiming_normal(key, shape, fan_in):
    # PyTorch kaiming_normal_ default: fan_in mode, gain=sqrt(2) (leaky_relu a=0)
    std = (2.0 / fan_in) ** 0.5
    return std * jax.random.normal(key, shape, dtype=jnp.float32)


if __name__ == "__main__":
    # Small synthetic config: embed_size=32, sequence length T=8,
    # num_class = len('0123456789abcdefghijklmnopqrstuvwxyz') + 1 blank = 37
    # (ACELabelConverter adds a blank token).
    B, T, E = 2, 8, 32
    C = 37

    key = jax.random.PRNGKey(0)
    k_x, k_w = jax.random.split(key)

    encode_feature = jax.random.normal(k_x, (B, T, E), dtype=jnp.float32)

    # init_weights(pretrained=None): weight -> kaiming_normal_, bias -> 0.0
    weight = _kaiming_normal(k_w, (C, E), fan_in=E)   # PyTorch (out, in) layout
    bias = jnp.zeros((C,), dtype=jnp.float32)

    # One-time prep: transpose + lane-pad the class axis (hoisted off hot path).
    w_t_pad, b_pad, num_class = prepare_ace_head_params(weight, bias)

    pred = ace_head_forward(encode_feature, w_t_pad, b_pad, num_class=num_class)
    pred = jax.block_until_ready(pred)

    # Sanity check vs plain-JAX reference (Linear + Softmax, f32).
    ref = jax.nn.softmax(encode_feature @ weight.T + bias, axis=-1)
    assert pred.shape == (B, T, C)
    assert jnp.allclose(pred, ref, atol=1e-5, rtol=1e-5)
    assert jnp.allclose(jnp.sum(pred, axis=-1), 1.0, atol=1e-5)

    print("KERNEL_OK")
</pallas_src>

<mosaic_0001>
module attributes {stable_mosaic.version = 11 : i64} {
  func.func @ace_head_kernel(%arg0: i32, %arg1: memref<8x32xf32, #tpu.memory_space<vmem>>, %arg2: memref<32x128xf32, #tpu.memory_space<vmem>>, %arg3: memref<1x128xf32, #tpu.memory_space<vmem>>, %arg4: memref<8x128xf32, #tpu.memory_space<vmem>>) attributes {dimension_semantics = [#tpu.dimension_semantics<parallel>], iteration_bounds = array<i64: 2>, scalar_prefetch = 0 : i64, scratch_operands = 0 : i64, tpu.core_type = #tpu.core_type<tc>, window_params = [{transform_indices = @transform_0, window_bounds = array<i64: 8, 32>}, {pipeline_mode = #tpu.pipeline_mode<synchronous>, transform_indices = @transform_1, window_bounds = array<i64: 32, 128>}, {pipeline_mode = #tpu.pipeline_mode<synchronous>, transform_indices = @transform_2, window_bounds = array<i64: 1, 128>}, {transform_indices = @transform_3, window_bounds = array<i64: 8, 128>}]} {
    %c0 = arith.constant 0 : index
    %c0_0 = arith.constant 0 : index
    %0 = vector.load %arg1[%c0, %c0_0] : memref<8x32xf32, #tpu.memory_space<vmem>>, vector<8x32xf32>
    %c0_1 = arith.constant 0 : index
    %c0_2 = arith.constant 0 : index
    %1 = vector.load %arg2[%c0_1, %c0_2] : memref<32x128xf32, #tpu.memory_space<vmem>>, vector<32x128xf32>
    %cst = arith.constant dense<0.000000e+00> : vector<8x128xf32>
    %2 = tpu.matmul %0, %1, %cst {dimension_numbers = #tpu.dot_dimension_numbers<[1], [0], [0], [1], [0, 0, 1, 1], [], []>} : vector<8x32xf32>, vector<32x128xf32>, vector<8x128xf32> -> vector<8x128xf32>
    %c0_3 = arith.constant 0 : index
    %c0_4 = arith.constant 0 : index
    %3 = vector.load %arg3[%c0_3, %c0_4] : memref<1x128xf32, #tpu.memory_space<vmem>>, vector<1x128xf32>
    %4 = vector.broadcast %3 : vector<1x128xf32> to vector<8x128xf32>
    %5 = arith.addf %2, %4 : vector<8x128xf32>
    %cst_5 = arith.constant dense<0xFF800000> : vector<8xf32>
    %6 = vector.multi_reduction <maximumf>, %5, %cst_5 [1] : vector<8x128xf32> to vector<8xf32>
    %7 = vector.shape_cast %6 : vector<8xf32> to vector<8x1xf32>
    %8 = vector.broadcast %7 : vector<8x1xf32> to vector<8x128xf32>
    %9 = arith.subf %5, %8 : vector<8x128xf32>
    %10 = math.exp %9 : vector<8x128xf32>
    %cst_6 = arith.constant dense<0.000000e+00> : vector<8xf32>
    %11 = vector.multi_reduction <add>, %10, %cst_6 [1] : vector<8x128xf32> to vector<8xf32>
    %12 = vector.shape_cast %11 : vector<8xf32> to vector<8x1xf32>
    %13 = tpu.reciprocal %12 : vector<8x1xf32> -> vector<8x1xf32>
    %14 = vector.broadcast %13 : vector<8x1xf32> to vector<8x128xf32>
    %15 = arith.mulf %10, %14 : vector<8x128xf32>
    %c0_7 = arith.constant 0 : index
    %c0_8 = arith.constant 0 : index
    %16 = vector.load %arg4[%c0_7, %c0_8] : memref<8x128xf32, #tpu.memory_space<vmem>>, vector<8x128xf32>
    tpu.vector_store %arg4[%c0_7, %c0_8], %15 {strides = array<i32>} : memref<8x128xf32, #tpu.memory_space<vmem>>, vector<8x128xf32>,
    return
  }
  func.func @transform_0(%arg0: i32) -> (i32, i32) {
    %c0_i32 = arith.constant 0 : i32
    %c0_i32_0 = arith.constant 0 : i32
    return %arg0, %c0_i32 : i32, i32
  }
  func.func @transform_1(%arg0: i32) -> (i32, i32) {
    %c0_i32 = arith.constant 0 : i32
    %c0_i32_0 = arith.constant 0 : i32
    %c0_i32_1 = arith.constant 0 : i32
    return %c0_i32, %c0_i32_0 : i32, i32
  }
  func.func @transform_2(%arg0: i32) -> (i32, i32) {
    %c0_i32 = arith.constant 0 : i32
    %c0_i32_0 = arith.constant 0 : i32
    %c0_i32_1 = arith.constant 0 : i32
    return %c0_i32, %c0_i32_0 : i32, i32
  }
  func.func @transform_3(%arg0: i32) -> (i32, i32) {
    %c0_i32 = arith.constant 0 : i32
    %c0_i32_0 = arith.constant 0 : i32
    return %arg0, %c0_i32 : i32, i32
  }
}

</mosaic_0001>

<bundles_post_ra>
// kernel: ace_head_forward.1
= control target key start
LH: loop header
LB: loop body
LE: loop exit
PB: predicated region body
PF: predicated region fallthrough
CT: control target
= control target key end

     0   :  { %8 = vsyncpa [#allocation3], 0  ;;  %s734_s0 = inlined_call_operand.hbm [shape: f32[16,32], index: 0, kind: input, shape index: {}]   ;;  %s735_s1 = inlined_call_operand.hbm [shape: f32[32,128], index: 1, kind: input, shape index: {}]   ;;  %s736_s2 = inlined_call_operand.vmem [shape: f32[1,128], index: 2, kind: input, shape index: {}]   ;;  %s737_s3 = inlined_call_operand.vmem [shape: f32[16,128], index: 3, kind: output, shape index: {}]  }
   0x1   :  { %10 = vsyncpa [#allocation3 + $0x1], 0 }
   0x2   :  { %11 = vsyncpa [#allocation5], 0  ;;  %s592_s12 = smov 0   ;;  %s594_s13 = smov 0  }
   0x3   :  { %s596_s14 = smov 0   ;;  %s598_s15 = smov 0  }
   0x4 LB: > { %s611_s16 = sadd.s32 4294967295, %s563_s15   ;;  %p37_p0 = scmp.ne.s32.totalorder %s555_s13, %s551_s12  ;;  %s563_s15 = sphi %s598_s15, %s752_s15   ;;  %s559_s14 = sphi %s596_s14, %s751_s14   ;;  %s555_s13 = sphi %s594_s13, %s750_s13   ;;  %s551_s12 = sphi %s592_s12, %s749_s12  }
   0x5   : > { %p738_p1 = scmp.eq.s32.totalorder %s611_s16, 0  ;;  %p373_p2 = scmp.ge.s32.totalorder %s563_s15, 1 }
   0x6   : > { %p116_p3 = scmp.lt.s32.totalorder %s563_s15, 3  ;;  %s565_s19 = smov [#allocation4]  }
   0x7   : > { %p619_p4 = por %p738_p1, %p37_p0  ;;  %s128_s20 = sshll.u32 %s565_s19, 4  ;;  %s129_s20 = int_to_ptr.vmem [resolvable:$true] %s128_s20 }
   0x8   : > { %p623_p5 = pnand %p373_p2, %p116_p3  ;;  %s636_s22 = sadd.s32 1, %s563_s15  }
   0x9   : > { %s741_s17 = scalar_select %p619_p4, 1, 0 }
   0xa   : > { %s742_s18 = scalar_select %p623_p5, 1, 0 }
   0xb   : > { %p414_p6 = pneg %p623_p5  ;;  %s24_s23 = sadd.s32 1, %s559_s14 }
   0xc   : > { %s21_s24 = ssub.s32 %s563_s15, %s636_s22  ;;  %s467_s27 = scalar_lea.hbm %s735_s1, 512 }
   0xd   : > { %p631_p7 = pnand %p414_p6, %p738_p1  ;;  %p468_p8 = scmp.ne.s32.totalorder %s735_s1, %s467_s27 }
   0xe   : > { %p474_p12 = scmp.lt.u32.totalorder %s467_s27, %s735_s1 }
   0xf   : > { %p469_p9 = pneg %p631_p7 }
  0x11   : > { %p470_p10 = pnand %p469_p9, %p468_p8 }
  0x13   : > { %p471_p11 = pneg %p470_p10 }
  0x15   : > { %p476_p13 = pnand %p474_p12, %p471_p11 }
  0x17   : > { %479 = shalt.err (!%p476_p13)
}
  0x18   : > { %s480_s5 = scalar_lea.vmem %s129_s20, 512  ;;  %p488_p6 = scmp.lt.s32.totalorder %s129_s20, %s129_s20 }
  0x19   : > { %p481_p0 = scmp.ne.s32.totalorder %s129_s20, %s480_s5  ;;  %p489_p1 = scmp.lt.s32.totalorder %s480_s5, %s480_s5 }
  0x1b   : > { %p483_p2 = pnand %p481_p0, %p469_p9  ;;  %p490_p4 = por %p489_p1, %p488_p6 }
  0x1d   : > { %p484_p3 = pneg %p483_p2 }
  0x1f   : > { %p491_p5 = pnand %p490_p4, %p484_p3 }
  0x21   : > { %494 = shalt.err (!%p491_p5)
}
  0x22   : > { %s566_s6 = smov 128   ;;  %s567_s7 = smov 8  }
  0x23   : > { %417 = dma.hbm_to_vmem [thread:$0]  (!%p631_p7), %s735_s1, 512, %s129_s20, [#allocation5], %s566_s6, %s566_s6, %s567_s7  }
  0x24   : > { %p22_p8 = scmp.eq.s32.totalorder %s21_s24, 0  ;;  %p31_p9 = scmp.ne.s32.totalorder %s559_s14, %s555_s13 }
  0x25   : > { %p32_p1 = scmp.eq.s32.totalorder %s563_s15, 0  ;;  %p423_p4 = scmp.lt.s32.totalorder %s563_s15, 2 }
  0x26   : > { %s662_s10 = scalar_select %p22_p8, %s559_s14, %s24_s23  }
  0x27   : > { %p33_p5 = por %p32_p1, %p31_p9  ;;  %s145_s11 = sand.u32 1, %s559_s14  }
  0x28   : > { %s376_s12 = sshll.u32 %s145_s11, 3  ;;  %s377_s19 = sshll.u32 %s563_s15, 7 }
  0x29   : > { %s669_s27 = scalar_lea.hbm %s734_s0, %s377_s19  ;;  %s149_s20 = scalar_lea.vmem [#allocation2], %s376_s12 }
  0x2a   : > { %s156_s21 = sshll.u32 %s149_s20, 4  ;;  %p673_p7 = pnand %p423_p4, %p33_p5  ;;  %s671_s21 = int_to_ptr.vmem [resolvable:$true] %s156_s21 }
  0x2b   : > { %s146_s15 = scalar_lea.sflag [#allocation3], %s145_s11  ;;  %s495_s24 = scalar_lea.hbm %s669_s27, 128 }
  0x2c   : > { %p496_p10 = scmp.ne.s32.totalorder %s669_s27, %s495_s24  ;;  %p497_p11 = pneg %p673_p7 }
  0x2d   : > { %s500_s30 = scalar_lea.hbm %s734_s0, 256  ;;  %p501_p0 = scmp.lt.u32.totalorder %s669_s27, %s734_s0 }
  0x2e   : > { %p498_p12 = pnand %p497_p11, %p496_p10  ;;  %p502_p2 = scmp.lt.u32.totalorder %s500_s30, %s495_s24 }
  0x2f   : > { %p504_p6 = scmp.lt.u32.totalorder %s495_s24, %s669_s27 }
  0x30   : > { %p499_p13 = pneg %p498_p12  ;;  %p503_p3 = por %p502_p2, %p501_p0 }
  0x32   : > { %p505_p8 = por %p504_p6, %p503_p3 }
  0x34   : > { %p506_p9 = pnand %p505_p8, %p499_p13 }
  0x36   : > { %509 = shalt.err (!%p506_p9)
}
  0x37   : > { %s510_s6 = scalar_lea.vmem %s671_s21, 128  ;;  %s568_s7 = smov [#allocation2]  }
  0x38   : > { %p511_p1 = scmp.ne.s32.totalorder %s671_s21, %s510_s6  ;;  %s515_s8 = sshll.u32 %s568_s7, 4  ;;  %s516_s8 = int_to_ptr.vmem [resolvable:$false] %s515_s8 }
  0x39   : > { %s517_s9 = scalar_lea.vmem %s516_s8, 256  ;;  %p518_p10 = scmp.lt.s32.totalorder %s671_s21, %s516_s8 }
  0x3a   : > { %p513_p4 = pnand %p511_p1, %p497_p11  ;;  %p519_p12 = scmp.lt.s32.totalorder %s517_s9, %s510_s6 }
  0x3c   : > { %p514_p5 = pneg %p513_p4  ;;  %p520_p0 = por %p519_p12, %p518_p10 }
  0x3e   : > { %p521_p2 = pnand %p520_p0, %p514_p5 }
  0x40   : > { %524 = shalt.err (!%p521_p2)
}
  0x41   : > { %421 = dma.hbm_to_vmem [thread:$0]  (!%p673_p7), %s669_s27, 128, %s671_s21, %s146_s15  }
  0x42   : > { %p745_p13 = scmp.ne.s32.totalorder %s742_s18, 0 }
  0x43   : > { %s167_s11 = sand.u32 (!%p745_p13), 1, %s555_s13   ;;  %p746_p11 = scmp.ne.s32.totalorder (!%p745_p13), %s741_s17, 0 }
  0x44   : > { %165 = sbr.rel (%p745_p13) target bundleno = 616 (0x268), region = 32  ;;  %s379_s12 = sshll.u32 (!%p745_p13), %s167_s11, 3 }
  0x45   : > { %s168_s19 = scalar_lea.sflag (!%p745_p13), [#allocation3], %s167_s11  ;;  %s171_s25 = scalar_lea.vmem (!%p745_p13), [#allocation2], %s379_s12 }
  0x4b   : > { %542 = dma.done.wait (%p746_p11), %s168_s19, 128  }
  0x4c   : > { %544 = vsyncadd (%p746_p11), %s168_s19, 4294967168  ;;  %p747_p3 = scmp.eq.s32.totalorder %s611_s16, 0 }
  0x4e   : > { %546 = dma.done.wait (%p747_p3), [#allocation5], 512   ;;  %p748_p6 = pmov %p747_p3 }
  0x4f   : > { %v569_v0 = vmov 0.0|0.0   ;;  %vm570_vm0 = vmmov 0   ;;  %v571_v1 = vmov 0.0   ;;  %v202_v2 = vld [vmem:[#allocation4] sm:$0xff]  ;;  %v203_v3 = vld [vmem:[#allocation4 + $0x8] sm:$0xff]  ;;  %v204_v4 = vld [vmem:[#allocation4 + $0x10] sm:$0xff] }
  0x50   : > { %548 = vsyncadd (%p748_p6), [#allocation5], 4294966784  ;;  %402 = vmatprep.subr.bf16.mxu0 %v569_v0  ;;  %399 = vmatprep.mubr.msk.f32.mxu0 %vm570_vm0, %v571_v1  ;;  %v403_v5 = vpack.c.bf16 %v203_v3, %v202_v2  ;;  %v205_v6 = vld [vmem:[#allocation4 + $0x18] sm:$0xff]  ;;  %vm213_vm1 = vcmask 261120   ;;  %v382_v9 = vld [vmem:[%s736_s2] ss:$0 sm:$0xff] }
  0x51   : > { %v406_v7 = vpack.c.bf16 %v205_v6, %v204_v4  ;;  %v201_v8 = vld [vmem:[%s171_s25] sm:$0xff]  ;;  %p197_p7 = scmp.lt.s32.totalorder %s611_s16, 1 }
  0x52   : > { %404 = vmatpush3.bf16.msra.mxu0 %v403_v5 }
  0x53   : > { %405 = vmatprep.subr.bf16.mxu0 %v569_v0  ;;  %s754_s16 = smov (!%p197_p7, %s611_s16), 1 }
  0x54   : > { %s381_s26 = sshll.u32 %s754_s16, 3 }
  0x55   : > { %s200_s21 = scalar_lea.vmem %s737_s3, %s381_s26 }
  0x56   : > { %407 = vmatpush3.bf16.msra.mxu0 %v406_v7 }
  0x59   : > { %400 = vmatmul.mubr.msk.f32.vlgmr.msra.gmra.mrb[0].mxu0 %vm213_vm1, %v201_v8 }
 0x12c   : > { %v283_v10 = vpop.f32.mrb[0].mxu0 }
 0x12d   : > { %v284_v11 = vadd.f32 %v382_v9, %v283_v10  ;;  %v401_v12 = vpop.f32.mrb[1].mxu0 }
 0x12f   : > { %287 = vmax.xlane.f32.xlu0 %v284_v11 }
 0x1bc   : > { %v288_v13 = vpop.xlane.xlu0 %287 }
 0x1bd   : > { %v289_v14 = vsub.f32 %v284_v11, %v288_v13 }
 0x1bf   : > { %v290_v15 = vmul.f32 1.442695, %v289_v14 }
 0x1c1   : > { %463 = vpow2.f32 %v290_v15 }
 0x1cb   : > { %v464_v16 = vpop.eup %463 }
 0x1cc   : > { %292 = vadd.xlane.f32.xlu0 %v464_v16 }
 0x259   : > { %v293_v17 = vpop.xlane.xlu0 %292 }
 0x25a   : > { %465 = vrcp.f32 %v293_v17 }
 0x264   : > { %v466_v18 = vpop.eup %465 }
 0x265   : > { %v295_v19 = vmul.f32 %v466_v18, %v464_v16 }
 0x267   : > { %296 = vst [vmem:[%s200_s21] sm:$0xff] %v295_v19 }
 0x268 PF: > { %p14_p8 = scmp.ge.s32.totalorder %s636_s22, 4   ;;  %s749_s12 = smov %s555_s13 }
 0x269   : > { %s750_s13 = smov %s559_s14  ;;  %s751_s14 = smov %s662_s10 }
 0x26a   : > { %s752_s15 = smov %s636_s22  ;;  %16 = sbr.rel (!%p14_p8) target bundleno = 4 (0x4), region = 76 }
 0x271   :  { %316 = vsyncpa [#allocation3], 1 }
 0x272   :  { %318 = vsyncpa [#allocation3 + $0x1], 1 }
 0x273   :  { %319 = vsyncpa [#allocation5], 1 }

</bundles_post_ra>
